<compile_context>
chip_gen: v6e
topology: v6e:2x2x1
jax: 0.10.0
libtpu: 0.0.40
codegen_flags: <defaults>
</compile_context>

<pallas_src>
import math

import jax
import jax.numpy as jnp
from jax.experimental import pallas as pl
from jax.experimental.pallas import tpu as pltpu


# ---------------------------------------------------------------------------
# Kernels
# ---------------------------------------------------------------------------

def kv_proj_kernel(x_cn_ref, x_nc_ref, wk_ref, bk_ref, wv_ref, bv_ref,
                   kt_ref, v_ref):
    """Projects one (batch, token-tile) of x into K^T (C, TN) and V (TN, C), bf16."""
    # K^T tile, MXU-native: wk is kept in the PyTorch (C_out, C_in) layout and
    # x_cn is the NCHW view (C_in, TN), so kt[o, t] = sum_c wk[o, c] * x[c, t].
    kt = jnp.dot(wk_ref[...], x_cn_ref[0].astype(jnp.bfloat16),
                 preferred_element_type=jnp.float32) + bk_ref[...]       # (C, TN) f32
    kt_ref[0] = kt.astype(jnp.bfloat16)
    # V tile, computed after K^T has been stored so only one f32 projection
    # temporary is live at the peak.
    v = jnp.dot(x_nc_ref[0].astype(jnp.bfloat16), wv_ref[...],
                preferred_element_type=jnp.float32) + bv_ref[...]        # (TN, C) f32
    v_ref[0] = v.astype(jnp.bfloat16)


def attn_block_kernel(x_ref, kt_ref, v_ref, wq_ref, bq_ref, wp_ref, bp_ref,
                      o_ref):
    """One (batch, query-tile) step of the attention block (+ residual)."""
    x_t = x_ref[0]                                                       # (TQ, C) f32

    # Q projection; the 1/sqrt(C) scale is already folded into wq / bq.
    q_t = jnp.dot(x_t.astype(jnp.bfloat16), wq_ref[...],
                  preferred_element_type=jnp.float32) + bq_ref[...]      # (TQ, C) f32

    # Scores against the precomputed, MXU-native K^T: (TQ, C) @ (C, N).
    s = jnp.dot(q_t.astype(jnp.bfloat16), kt_ref[0],
                preferred_element_type=jnp.float32)                      # (TQ, N) f32

    # Numerically stable softmax. Probabilities are written once, in bf16
    # (single pass over the (TQ, N) tile); the denominator is accumulated in
    # f32 from the bf16 tile and the normalization is deferred to the much
    # smaller (TQ, C) output.
    m = jnp.max(s, axis=-1, keepdims=True)
    p = jnp.exp(s - m).astype(jnp.bfloat16)                              # (TQ, N) bf16
    denom = jnp.sum(p, axis=-1, keepdims=True, dtype=jnp.float32)        # (TQ, 1) f32

    h = jnp.dot(p, v_ref[0], preferred_element_type=jnp.float32)         # (TQ, C) f32
    h = h * pl.reciprocal(denom, approx=True)

    # Output 1x1-conv projection + residual (residual stays f32).
    h = jnp.dot(h.astype(jnp.bfloat16), wp_ref[...],
                preferred_element_type=jnp.float32) + bp_ref[...]
    o_ref[0] = (x_t + h).astype(o_ref.dtype)


# ---------------------------------------------------------------------------
# Chip-aware configuration helpers
# ---------------------------------------------------------------------------

def _device_kind():
    try:
        return jax.devices()[0].device_kind.lower()
    except Exception:
        return ""


def _is_v7():
    return "v7" in _device_kind()


def _pick_tq(n, requested=None):
    """Query tile: smaller default on v7x (64 MiB VMEM), 512 on v5e/v6e."""
    if requested is not None:
        tq = int(requested)
    else:
        tq = min(256 if _is_v7() else 512, n)
        while tq > 8 and n % tq != 0:
            tq //= 2
        if n % tq != 0:
            tq = n
    assert n % tq == 0, f"query tile {tq} must divide N={n}"
    assert tq == n or tq % 8 == 0, "query tile must be a multiple of 8 (sublane)"
    return tq


def _pick_tn(n):
    """Token tile for the K/V projection; the K^T block needs it %128 (or == N)."""
    tn = min(512, n)
    while tn >= 256 and n % tn != 0:
        tn //= 2
    if n % tn != 0 or (tn != n and tn % 128 != 0):
        tn = n
    return tn


def _vmem_limit_bytes():
    cap = 0
    try:
        cap = int(getattr(pltpu.get_tpu_info(), "vmem_capacity_bytes", 0))
    except Exception:
        cap = 0
    if cap < 32 * 1024 * 1024:
        # Fallback keyed off the chip generation: only v7x has 64 MiB of
        # physical VMEM; v5e / v6e have 128 MiB, so don't throttle them.
        cap = (64 if _is_v7() else 128) * 1024 * 1024
    return (cap // 4) * 3                 # leave ~25% headroom below physical


# ---------------------------------------------------------------------------
# Wrapper
# ---------------------------------------------------------------------------

def attn_block_pallas(x_nchw, params, tq=None):
    """Runs AttnBlock.forward. x_nchw: (B, C, H, W) float32. Returns (B, C, H, W)."""
    B, C, H, W = x_nchw.shape
    N = H * W
    TQ = _pick_tq(N, tq)
    TN = _pick_tn(N)

    # Token views of x: (B, N, C) for Q / V / residual, and the free NCHW
    # reshape (B, C, N) for the MXU-native K^T projection.
    x_tok = jnp.transpose(x_nchw, (0, 2, 3, 1)).reshape(B, N, C)
    x_cn = x_nchw.reshape(B, C, N)

    # PyTorch 1x1-conv weight (C_out, C_in, 1, 1):
    #   (C_in, C_out) bf16 for x @ W projections (Q, V, output proj),
    #   (C_out, C_in) bf16 for the K^T projection (left operand).
    def prep_w_in_out(w, scale=1.0):
        return (jnp.transpose(w.reshape(C, C), (1, 0)) * scale).astype(jnp.bfloat16)

    def prep_w_out_in(w):
        return w.reshape(C, C).astype(jnp.bfloat16)

    scale = float(C) ** -0.5              # matches `int(C) ** -0.5` in PyTorch
    wq = prep_w_in_out(params["wq"], scale)
    bq = (params["bq"].reshape(1, C) * scale).astype(jnp.float32)
    wk = prep_w_out_in(params["wk"])
    bk = params["bk"].reshape(C, 1).astype(jnp.float32)
    wv = prep_w_in_out(params["wv"])
    bv = params["bv"].reshape(1, C).astype(jnp.float32)
    wp = prep_w_in_out(params["wp"])
    bp = params["bp"].reshape(1, C).astype(jnp.float32)

    vmem_limit = _vmem_limit_bytes()
    bspec = lambda shape: pl.BlockSpec(shape, lambda b, i: (0, 0))

    # --- Stage 1: K^T / V projection to bf16, tiled over (batch, token tile).
    kv_cost = pl.CostEstimate(
        flops=2 * 2 * B * N * C * C,
        transcendentals=0,
        bytes_accessed=(2 * B * N * C * 4 + 2 * B * N * C * 2
                        + 2 * C * C * 2 + 2 * C * 4),
    )
    kt, v = pl.pallas_call(
        kv_proj_kernel,
        out_shape=(jax.ShapeDtypeStruct((B, C, N), jnp.bfloat16),
                   jax.ShapeDtypeStruct((B, N, C), jnp.bfloat16)),
        grid_spec=pltpu.PrefetchScalarGridSpec(
            num_scalar_prefetch=0,
            grid=(B, N // TN),
            in_specs=[
                pl.BlockSpec((1, C, TN), lambda b, n: (b, 0, n)),  # x, (C, N) view
                pl.BlockSpec((1, TN, C), lambda b, n: (b, n, 0)),  # x, (N, C) view
                bspec((C, C)), bspec((C, 1)),                      # wk, bk
                bspec((C, C)), bspec((1, C)),                      # wv, bv
            ],
            out_specs=(
                pl.BlockSpec((1, C, TN), lambda b, n: (b, 0, n)),  # K^T
                pl.BlockSpec((1, TN, C), lambda b, n: (b, n, 0)),  # V
            ),
        ),
        compiler_params=pltpu.CompilerParams(
            dimension_semantics=("parallel", "parallel"),
            vmem_limit_bytes=vmem_limit),
        cost_estimate=kv_cost,
    )(x_cn, x_tok, wk, bk, wv, bv)

    # --- Stage 2: attention over query tiles. K^T / V are resident per batch
    # element; there is no cross-iteration state, so both grid axes are
    # parallel (keeps both v7x TensorCores busy even when B == 1).
    attn_cost = pl.CostEstimate(
        flops=2 * B * (2 * N * C * C + 2 * N * N * C),
        transcendentals=B * N * N,
        bytes_accessed=(2 * B * N * C * 4          # x in + out (f32)
                        + 2 * B * N * C * 2        # K^T + V (bf16)
                        + 2 * C * C * 2 + 2 * C * 4),
    )
    out_tok = pl.pallas_call(
        attn_block_kernel,
        out_shape=jax.ShapeDtypeStruct((B, N, C), x_tok.dtype),
        grid_spec=pltpu.PrefetchScalarGridSpec(
            num_scalar_prefetch=0,
            grid=(B, N // TQ),
            in_specs=[
                pl.BlockSpec((1, TQ, C), lambda b, q: (b, q, 0)),  # x (query tile + residual)
                pl.BlockSpec((1, C, N), lambda b, q: (b, 0, 0)),   # K^T, resident per batch elem
                pl.BlockSpec((1, N, C), lambda b, q: (b, 0, 0)),   # V,   resident per batch elem
                bspec((C, C)), bspec((1, C)),                      # wq, bq (scale folded in)
                bspec((C, C)), bspec((1, C)),                      # wp, bp
            ],
            out_specs=pl.BlockSpec((1, TQ, C), lambda b, q: (b, q, 0)),
        ),
        compiler_params=pltpu.CompilerParams(
            dimension_semantics=("parallel", "parallel"),
            vmem_limit_bytes=vmem_limit),
        cost_estimate=attn_cost,
    )(x_tok, kt, v, wq, bq, wp, bp)

    # (B, N, C) -> NCHW
    return jnp.transpose(out_tok.reshape(B, H, W, C), (0, 3, 1, 2))


# ---------------------------------------------------------------------------
# Reference, params and self-test
# ---------------------------------------------------------------------------

def init_params(key, C):
    """Deterministic init matching AttnBlock.initialize():
       xavier_uniform on conv weights (fan_in = fan_out = C for a 1x1 conv),
       zeros for biases, gain=1e-5 for the final proj weight."""
    def xavier_uniform(k, gain=1.0):
        bound = gain * math.sqrt(6.0 / (C + C))
        return jax.random.uniform(k, (C, C, 1, 1), jnp.float32, -bound, bound)

    kq, kk, kv, kp = jax.random.split(key, 4)
    return {
        "wq": xavier_uniform(kq), "bq": jnp.zeros((C,), jnp.float32),
        "wk": xavier_uniform(kk), "bk": jnp.zeros((C,), jnp.float32),
        "wv": xavier_uniform(kv), "bv": jnp.zeros((C,), jnp.float32),
        "wp": xavier_uniform(kp, gain=1e-5), "bp": jnp.zeros((C,), jnp.float32),
    }


def random_params(key, C):
    """Generic unit-gain params with non-zero biases: used only so the
       attention branch is observable above the residual in the larger test."""
    ks = jax.random.split(key, 8)
    bound = math.sqrt(6.0 / (C + C))

    def w(k):
        return jax.random.uniform(k, (C, C, 1, 1), jnp.float32, -bound, bound)

    def b(k):
        return 0.1 * jax.random.normal(k, (C,), jnp.float32)

    return {"wq": w(ks[0]), "bq": b(ks[1]), "wk": w(ks[2]), "bk": b(ks[3]),
            "wv": w(ks[4]), "bv": b(ks[5]), "wp": w(ks[6]), "bp": b(ks[7])}


def attn_block_ref(x_nchw, params):
    """Pure-JAX f32 reference of the PyTorch forward."""
    B, C, H, W = x_nchw.shape
    N = H * W
    x_tok = jnp.transpose(x_nchw, (0, 2, 3, 1)).reshape(B, N, C)

    def proj(x, w, b):
        return jnp.einsum('bnc,oc->bno', x, w.reshape(C, C)) + b

    q = proj(x_tok, params["wq"], params["bq"])
    k = proj(x_tok, params["wk"], params["bk"])
    v = proj(x_tok, params["wv"], params["bv"])
    w = jnp.einsum('bqc,bkc->bqk', q, k) * (C ** -0.5)
    w = jax.nn.softmax(w, axis=-1)
    h = jnp.einsum('bqk,bkc->bqc', w, v)
    h = proj(h, params["wp"], params["bp"])
    out = x_tok + h
    return jnp.transpose(out.reshape(B, H, W, C), (0, 3, 1, 2))


if __name__ == "__main__":
    key = jax.random.PRNGKey(0)
    kx1, kp1, kx2, kp2 = jax.random.split(key, 4)

    # --- Test 1: module-faithful init at a small shape. Residual-dominated
    # strict check plus a relative check on the attention branch itself.
    B, C, H, W = 2, 4, 16, 16
    x = jax.random.normal(kx1, (B, C, H, W), jnp.float32)
    params = init_params(kp1, C)
    ref = attn_block_ref(x, params)
    for tq in (None, 64):   # auto tile and an explicit multi-query-tile run
        out = jax.block_until_ready(attn_block_pallas(x, params, tq=tq))
        assert out.shape == (B, C, H, W)
        assert jnp.allclose(out, ref, atol=1e-4, rtol=1e-4), (
            f"tq={tq}: max err {jnp.max(jnp.abs(out - ref))}")
        h_out, h_ref = out - x, ref - x
        h_err = jnp.max(jnp.abs(h_out - h_ref))
        h_tol = 0.1 * jnp.max(jnp.abs(h_ref)) + 1e-7
        assert h_err <= h_tol, f"tq={tq}: attention-branch err {h_err} > {h_tol}"

    # --- Test 2: lane-full channels, several query/token tiles and B == 1
    # (exercises the resident K^T/V path and the fully-parallel grid). Uses
    # unit-gain params so the attention branch is visible above the residual;
    # bf16 matmul operands -> few-percent relative tolerance on that branch.
    B2, C2, H2, W2 = 1, 128, 32, 32
    x2 = jax.random.normal(kx2, (B2, C2, H2, W2), jnp.float32)
    params2 = random_params(kp2, C2)
    ref2 = attn_block_ref(x2, params2)
    out2 = jax.block_until_ready(attn_block_pallas(x2, params2))
    assert out2.shape == (B2, C2, H2, W2)
    err2 = jnp.max(jnp.abs(out2 - ref2))
    tol2 = 0.05 * jnp.max(jnp.abs(ref2 - x2)) + 1e-5
    assert err2 <= tol2, f"large-shape err {err2} > {tol2}"

    print("KERNEL_OK")
</pallas_src>

<mosaic_0001>
module attributes {stable_mosaic.version = 11 : i64} {
  func.func @kv_proj_kernel(%arg0: i32, %arg1: i32, %arg2: memref<1x4x256xf32, #tpu.memory_space<vmem>>, %arg3: memref<1x256x4xf32, #tpu.memory_space<vmem>>, %arg4: memref<4x4xbf16, #tpu.memory_space<vmem>>, %arg5: memref<4x1xf32, #tpu.memory_space<vmem>>, %arg6: memref<4x4xbf16, #tpu.memory_space<vmem>>, %arg7: memref<1x4xf32, #tpu.memory_space<vmem>>, %arg8: memref<1x4x256xbf16, #tpu.memory_space<vmem>>, %arg9: memref<1x256x4xbf16, #tpu.memory_space<vmem>>) attributes {dimension_semantics = [#tpu.dimension_semantics<parallel>, #tpu.dimension_semantics<parallel>], iteration_bounds = array<i64: 2, 1>, scalar_prefetch = 0 : i64, scratch_operands = 0 : i64, tpu.core_type = #tpu.core_type<tc>, window_params = [{transform_indices = @transform_0, window_bounds = array<i64: 1, 4, 256>}, {transform_indices = @transform_1, window_bounds = array<i64: 1, 256, 4>}, {pipeline_mode = #tpu.pipeline_mode<synchronous>, transform_indices = @transform_2, window_bounds = array<i64: 4, 4>}, {pipeline_mode = #tpu.pipeline_mode<synchronous>, transform_indices = @transform_3, window_bounds = array<i64: 4, 1>}, {pipeline_mode = #tpu.pipeline_mode<synchronous>, transform_indices = @transform_4, window_bounds = array<i64: 4, 4>}, {pipeline_mode = #tpu.pipeline_mode<synchronous>, transform_indices = @transform_5, window_bounds = array<i64: 1, 4>}, {transform_indices = @transform_6, window_bounds = array<i64: 1, 4, 256>}, {transform_indices = @transform_7, window_bounds = array<i64: 1, 256, 4>}]} {
    %c0 = arith.constant 0 : index
    %c0_0 = arith.constant 0 : index
    %0 = vector.load %arg4[%c0, %c0_0] : memref<4x4xbf16, #tpu.memory_space<vmem>>, vector<4x4xbf16>
    %c0_1 = arith.constant 0 : index
    %c0_2 = arith.constant 0 : index
    %c0_3 = arith.constant 0 : index
    %1 = vector.load %arg2[%c0_1, %c0_2, %c0_3] : memref<1x4x256xf32, #tpu.memory_space<vmem>>, vector<1x4x256xf32>
    %2 = vector.shape_cast %1 : vector<1x4x256xf32> to vector<4x256xf32>
    %3 = arith.truncf %2 : vector<4x256xf32> to vector<4x256xbf16>
    %cst = arith.constant dense<0.000000e+00> : vector<4x256xf32>
    %4 = tpu.matmul %0, %3, %cst {dimension_numbers = #tpu.dot_dimension_numbers<[1], [0], [0], [1], [0, 0, 1, 1], [], []>} : vector<4x4xbf16>, vector<4x256xbf16>, vector<4x256xf32> -> vector<4x256xf32>
    %c0_4 = arith.constant 0 : index
    %c0_5 = arith.constant 0 : index
    %5 = vector.load %arg5[%c0_4, %c0_5] : memref<4x1xf32, #tpu.memory_space<vmem>>, vector<4x1xf32>
    %6 = vector.broadcast %5 : vector<4x1xf32> to vector<4x256xf32>
    %7 = arith.addf %4, %6 : vector<4x256xf32>
    %8 = arith.truncf %7 : vector<4x256xf32> to vector<4x256xbf16>
    %c0_6 = arith.constant 0 : index
    %c0_7 = arith.constant 0 : index
    %c0_8 = arith.constant 0 : index
    %9 = vector.load %arg8[%c0_6, %c0_7, %c0_8] : memref<1x4x256xbf16, #tpu.memory_space<vmem>>, vector<1x4x256xbf16>
    %10 = vector.shape_cast %9 : vector<1x4x256xbf16> to vector<4x256xbf16>
    %11 = vector.shape_cast %8 : vector<4x256xbf16> to vector<1x4x256xbf16>
    tpu.vector_store %arg8[%c0_6, %c0_7, %c0_8], %11 {strides = array<i32>} : memref<1x4x256xbf16, #tpu.memory_space<vmem>>, vector<1x4x256xbf16>,
    %c0_9 = arith.constant 0 : index
    %c0_10 = arith.constant 0 : index
    %c0_11 = arith.constant 0 : index
    %12 = vector.load %arg3[%c0_9, %c0_10, %c0_11] : memref<1x256x4xf32, #tpu.memory_space<vmem>>, vector<1x256x4xf32>
    %13 = vector.shape_cast %12 : vector<1x256x4xf32> to vector<256x4xf32>
    %14 = arith.truncf %13 : vector<256x4xf32> to vector<256x4xbf16>
    %c0_12 = arith.constant 0 : index
    %c0_13 = arith.constant 0 : index
    %15 = vector.load %arg6[%c0_12, %c0_13] : memref<4x4xbf16, #tpu.memory_space<vmem>>, vector<4x4xbf16>
    %cst_14 = arith.constant dense<0.000000e+00> : vector<256x4xf32>
    %16 = tpu.matmul %14, %15, %cst_14 {dimension_numbers = #tpu.dot_dimension_numbers<[1], [0], [0], [1], [0, 0, 1, 1], [], []>} : vector<256x4xbf16>, vector<4x4xbf16>, vector<256x4xf32> -> vector<256x4xf32>
    %c0_15 = arith.constant 0 : index
    %c0_16 = arith.constant 0 : index
    %17 = vector.load %arg7[%c0_15, %c0_16] : memref<1x4xf32, #tpu.memory_space<vmem>>, vector<1x4xf32>
    %18 = vector.broadcast %17 : vector<1x4xf32> to vector<256x4xf32>
    %19 = arith.addf %16, %18 : vector<256x4xf32>
    %20 = arith.truncf %19 : vector<256x4xf32> to vector<256x4xbf16>
    %c0_17 = arith.constant 0 : index
    %c0_18 = arith.constant 0 : index
    %c0_19 = arith.constant 0 : index
    %21 = vector.load %arg9[%c0_17, %c0_18, %c0_19] : memref<1x256x4xbf16, #tpu.memory_space<vmem>>, vector<1x256x4xbf16>
    %22 = vector.shape_cast %21 : vector<1x256x4xbf16> to vector<256x4xbf16>
    %23 = vector.shape_cast %20 : vector<256x4xbf16> to vector<1x256x4xbf16>
    tpu.vector_store %arg9[%c0_17, %c0_18, %c0_19], %23 {strides = array<i32>} : memref<1x256x4xbf16, #tpu.memory_space<vmem>>, vector<1x256x4xbf16>,
    return
  }
  func.func @transform_0(%arg0: i32, %arg1: i32) -> (i32, i32, i32) {
    %c0_i32 = arith.constant 0 : i32
    %c0_i32_0 = arith.constant 0 : i32
    return %arg0, %c0_i32, %arg1 : i32, i32, i32
  }
  func.func @transform_1(%arg0: i32, %arg1: i32) -> (i32, i32, i32) {
    %c0_i32 = arith.constant 0 : i32
    %c0_i32_0 = arith.constant 0 : i32
    return %arg0, %arg1, %c0_i32 : i32, i32, i32
  }
  func.func @transform_2(%arg0: i32, %arg1: i32) -> (i32, i32) {
    %c0_i32 = arith.constant 0 : i32
    %c0_i32_0 = arith.constant 0 : i32
    %c0_i32_1 = arith.constant 0 : i32
    return %c0_i32, %c0_i32_0 : i32, i32
  }
  func.func @transform_3(%arg0: i32, %arg1: i32) -> (i32, i32) {
    %c0_i32 = arith.constant 0 : i32
    %c0_i32_0 = arith.constant 0 : i32
    %c0_i32_1 = arith.constant 0 : i32
    return %c0_i32, %c0_i32_0 : i32, i32
  }
  func.func @transform_4(%arg0: i32, %arg1: i32) -> (i32, i32) {
    %c0_i32 = arith.constant 0 : i32
    %c0_i32_0 = arith.constant 0 : i32
    %c0_i32_1 = arith.constant 0 : i32
    return %c0_i32, %c0_i32_0 : i32, i32
  }
  func.func @transform_5(%arg0: i32, %arg1: i32) -> (i32, i32) {
    %c0_i32 = arith.constant 0 : i32
    %c0_i32_0 = arith.constant 0 : i32
    %c0_i32_1 = arith.constant 0 : i32
    return %c0_i32, %c0_i32_0 : i32, i32
  }
  func.func @transform_6(%arg0: i32, %arg1: i32) -> (i32, i32, i32) {
    %c0_i32 = arith.constant 0 : i32
    %c0_i32_0 = arith.constant 0 : i32
    return %arg0, %c0_i32, %arg1 : i32, i32, i32
  }
  func.func @transform_7(%arg0: i32, %arg1: i32) -> (i32, i32, i32) {
    %c0_i32 = arith.constant 0 : i32
    %c0_i32_0 = arith.constant 0 : i32
    return %arg0, %arg1, %c0_i32 : i32, i32, i32
  }
}

</mosaic_0001>

<bundles_post_ra>
// kernel: tpu_custom_call.1
= control target key start
LH: loop header
LB: loop body
LE: loop exit
PB: predicated region body
PF: predicated region fallthrough
CT: control target
= control target key end

     0   :  { %13 = vsyncpa [#allocation3], 0  ;;  %s1674_s0 = inlined_call_operand.vmem [shape: f32[2,4,256], index: 0, kind: input, shape index: {}]   ;;  %s1675_s1 = inlined_call_operand.vmem [shape: f32[2,256,4], index: 1, kind: input, shape index: {}]   ;;  %s1676_s2 = inlined_call_operand.vmem [shape: bf16[4,4], index: 2, kind: input, shape index: {}]   ;;  %s1677_s3 = inlined_call_operand.vmem [shape: f32[4,1], index: 3, kind: input, shape index: {}]   ;;  %s1678_s4 = inlined_call_operand.vmem [shape: bf16[4,4], index: 4, kind: input, shape index: {}]   ;;  %s1679_s5 = inlined_call_operand.vmem [shape: f32[1,4], index: 5, kind: input, shape index: {}]   ;;  %s1680_s6 = inlined_call_operand.hbm [shape: bf16[2,4,256], index: 6, kind: output, shape index: {0}]   ;;  %s1681_s7 = inlined_call_operand.vmem [shape: bf16[2,256,4], index: 7, kind: output, shape index: {1}]  }
   0x1   :  { %15 = vsyncpa [#allocation3 + $0x1], 0  ;;  %s1377_s24 = smov 0   ;;  %s1379_s25 = smov 0  }
   0x2   :  { %s1381_s26 = smov 0   ;;  %s1383_s27 = smov 0  }
   0x3   :  { %s1385_s28 = smov 0   ;;  %s1387_s29 = smov 0  }
   0x4 LB: > { %s1038_s30 = sadd.s32 4294967295, %s1333_s29   ;;  %s1039_s8 = sadd.s32 4294967294, %s1333_s29   ;;  %s1333_s29 = sphi %s1387_s29, %s21_s29   ;;  %s1329_s28 = sphi %s1385_s28, %s1688_s28   ;;  %s1325_s27 = sphi %s1383_s27, %s1687_s27   ;;  %s1321_s26 = sphi %s1381_s26, %s1686_s26   ;;  %s1317_s25 = sphi %s1379_s25, %s1685_s25   ;;  %s1313_s24 = sphi %s1377_s24, %s1684_s24  }
   0x5   : > { %s33_s9 = sadd.s32 1, %s1329_s28  ;;  %s182_s10 = sadd.s32 1, %s1321_s26 }
   0x6   : > { %p35_p0 = scmp.ge.s32.totalorder %s33_s9, 2  ;;  %p192_p1 = scmp.ne.s32.totalorder %s1321_s26, %s1317_s25 }
   0x7   : > { %p193_p2 = scmp.eq.s32.totalorder %s1038_s30, 1  ;;  %p198_p3 = scmp.ne.s32.totalorder %s1317_s25, %s1313_s24 }
   0x8   : > { %s1690_s9 = smov (%p35_p0, %s33_s9), 0  ;;  %p199_p5 = scmp.eq.s32.totalorder %s1039_s8, 1 }
   0x9   : > { %p1417_p4 = por %p193_p2, %p192_p1  ;;  %s177_s12 = ssub.s32 %s1329_s28, %s1690_s9 }
   0xa   : > { %p1042_p6 = scmp.ge.s32.totalorder %s1333_s29, 1  ;;  %p180_p7 = scmp.eq.s32.totalorder %s177_s12, 0 }
   0xb   : > { %p1424_p8 = por %p199_p5, %p198_p3  ;;  %p283_p9 = scmp.lt.s32.totalorder %s1333_s29, 3 }
   0xc   : > { %s1430_s14 = scalar_select %p180_p7, %s1321_s26, %s182_s10  }
   0xd   : > { %p284_p10 = pnand %p1042_p6, %p283_p9 }
   0xe   : > { %p338_p11 = scmp.lt.s32.totalorder (!%p284_p10), %s1325_s27, 1  ;;  %s1143_s8 = sshll.u32 (!%p284_p10), %s1325_s27, 6 }
   0xf   : > { %287 = sbr.rel (%p284_p10) target bundleno = 274 (0x112), region = 44  ;;  %s1544_s16 = scalar_lea.hbm (!%p284_p10), %s1680_s6, %s1143_s8 }
  0x14   : > { %vm386_vm0 = vcmask 1041408   ;;  %v496_v0 = vld [vmem:[%s1678_s4] sm:$0x3]  ;;  %v1335_v2 = vmov 0   ;;  %s1442_s19 = scalar_select %p338_p11, %s1325_s27, 1  ;;  %vm382_vm1 = vcmask 31744  }
  0x15   : > { %1198 = vmatprep.subr.msk.bf16.mxu1 %vm386_vm0, %v496_v0  ;;  %v553_v1 = vsel %vm386_vm0, %v496_v0, 0  ;;  %425 = vmatprep.mubr.bf16.mxu0 %v1335_v2  ;;  %v376_v3 = vld [vmem:[%s1677_s3] sm:$0xf]  ;;  %vm844_vm2 = vcmask 27648  }
  0x16   : > { %1196 = vmatpush3.bf16.msra.mxu1 %v553_v1  ;;  %1255 = vset.pattern.permute.xlu0 %v1335_v2  ;;  %s1109_s20 = sshll.u32 %s1442_s19, 8  ;;  %s1108_s21 = sshll.u32 %s1442_s19, 3  ;;  %v369_v24 = vld [vmem:[%s1676_s2] sm:$0x3] }
  0x17   : > { %379 = vperm.xlu0 %1255, %v376_v3   ;;  %s1449_s30 = scalar_lea.vmem %s1675_s1, %s1109_s20  ;;  %s345_s12 = scalar_lea.vmem %s1674_s0, %s1108_s21  ;;  %v1512_v58 = vld [vmem:[%s1679_s5] ss:$0 sm:$0xff] }
  0x18   : > { %v460_v4 = vld [vmem:[%s1449_s30 + $0x60] sm:$0xff]  ;;  %v461_v5 = vld [vmem:[%s1449_s30 + $0x68] sm:$0xff]  ;;  %v462_v6 = vld [vmem:[%s1449_s30 + $0x70] sm:$0xff]  ;;  %s1110_s20 = sshll.u32 %s1442_s19, 7  ;;  %s323_s21 = sand.u32 1, %s1317_s25  }
  0x19   : > { %v486_v7 = vpack.c.bf16 %v461_v5, %v460_v4  ;;  %v463_v8 = vld [vmem:[%s1449_s30 + $0x78] sm:$0xff]  ;;  %v370_v9 = vld [vmem:[%s345_s12] sm:$0xff]  ;;  %v465_v14 = vld [vmem:[%s1449_s30 + $0x88] sm:$0xff]  ;;  %s1525_s19 = sshll.u32 %s323_s21, 2  ;;  %s878_s17 = scalar_lea.sflag [#allocation3], %s323_s21 }
  0x1a   : > { %v464_v10 = vld [vmem:[%s1449_s30 + $0x80] sm:$0xff]  ;;  %v487_v11 = vpack.c.bf16 %v463_v8, %v462_v6  ;;  %v372_v12 = vcombine.high %v370_v9, %v370_v9  ;;  %v374_v13 = vpack.c.bf16 %v370_v9, %v370_v9  ;;  %v449_v19 = vld [vmem:[%s1449_s30 + $0x8] sm:$0xff]  ;;  %v466_v20 = vld [vmem:[%s1449_s30 + $0x90] sm:$0xff]  ;;  %s325_s10 = scalar_lea.vmem [#allocation2], %s1525_s19 }
  0x1b   : > { %1175 = vmatprep.mubr.msk.bf16.mxu1 %vm382_vm1, %v486_v7  ;;  %v488_v15 = vpack.c.bf16 %v465_v14, %v464_v10  ;;  %v448_v18 = vld [vmem:[%s1449_s30] sm:$0xff]  ;;  %v467_v21 = vld [vmem:[%s1449_s30 + $0x98] sm:$0xff]  ;;  %v469_v23 = vld [vmem:[%s1449_s30 + $0xa8] sm:$0xff]  ;;  %s903_s12 = sshll.u32 %s325_s10, 4  ;;  %s1546_s12 = int_to_ptr.vmem [resolvable:$true] %s903_s12 }
  0x1c   : > { %1176 = vmatmul.mubr.msk.bf16.vlgmr.msra.gmra.mxu1 %vm382_vm1, %v487_v11  ;;  %v375_v16 = vpack.c.bf16 %v372_v12, %v372_v12  ;;  %v388_v17 = vsel %vm386_vm0, %v374_v13, 0  ;;  %v468_v22 = vld [vmem:[%s1449_s30 + $0xa0] sm:$0xff]  ;;  %v480_v25 = vpack.c.bf16 %v449_v19, %v448_v18  ;;  %v489_v26 = vpack.c.bf16 %v467_v21, %v466_v20  ;;  %v450_v28 = vld [vmem:[%s1449_s30 + $0x10] sm:$0xff]  ;;  %v451_v29 = vld [vmem:[%s1449_s30 + $0x18] sm:$0xff]  ;;  %s1257_s18 = scalar_lea.vmem %s1546_s12, 64 }
  0x1d   : > { %1179 = vmatprep.mubr.msk.bf16.mxu1 %vm382_vm1, %v488_v15  ;;  %v490_v27 = vpack.c.bf16 %v469_v23, %v468_v22  ;;  %v452_v30 = vld [vmem:[%s1449_s30 + $0x20] sm:$0xff]  ;;  %v453_v31 = vld [vmem:[%s1449_s30 + $0x28] sm:$0xff]  ;;  %v470_v32 = vld [vmem:[%s1449_s30 + $0xb0] sm:$0xff]  ;;  %v481_v34 = vpack.c.bf16 %v451_v29, %v450_v28  ;;  %p1258_p12 = scmp.ne.s32.totalorder %s1546_s12, %s1257_s18 }
  0x1e   : > { %1050 = vmatprep.subr.msk.bf16.mxu0 %vm386_vm0, %v375_v16  ;;  %v471_v33 = vld [vmem:[%s1449_s30 + $0xb8] sm:$0xff]  ;;  %v472_v35 = vld [vmem:[%s1449_s30 + $0xc0] sm:$0xff]  ;;  %v473_v36 = vld [vmem:[%s1449_s30 + $0xc8] sm:$0xff]  ;;  %v482_v37 = vpack.c.bf16 %v453_v31, %v452_v30 }
  0x1f   : > { %408 = vmatpush1.bf16.msra.mxu0 %v388_v17  ;;  %v491_v38 = vpack.c.bf16 %v471_v33, %v470_v32  ;;  %v492_v39 = vpack.c.bf16 %v473_v36, %v472_v35  ;;  %v454_v40 = vld [vmem:[%s1449_s30 + $0x30] sm:$0xff]  ;;  %v455_v41 = vld [vmem:[%s1449_s30 + $0x38] sm:$0xff]  ;;  %v456_v42 = vld [vmem:[%s1449_s30 + $0x40] sm:$0xff]  ;;  %p1259_p13 = pnand %p1258_p12, %p1417_p4 }
  0x20   : > { %1197 = vmatprep.subr.msk.bf16.mxu0 %vm386_vm0, %v496_v0  ;;  %v457_v43 = vld [vmem:[%s1449_s30 + $0x48] sm:$0xff]  ;;  %v474_v44 = vld [vmem:[%s1449_s30 + $0xd0] sm:$0xff]  ;;  %v475_v45 = vld [vmem:[%s1449_s30 + $0xd8] sm:$0xff]  ;;  %v483_v46 = vpack.c.bf16 %v455_v41, %v454_v40 }
  0x21   : > { %v476_v47 = vld [vmem:[%s1449_s30 + $0xe0] sm:$0xff]  ;;  %v477_v48 = vld [vmem:[%s1449_s30 + $0xe8] sm:$0xff]  ;;  %v484_v49 = vpack.c.bf16 %v457_v43, %v456_v42  ;;  %v493_v50 = vpack.c.bf16 %v475_v45, %v474_v44  ;;  %v458_v52 = vld [vmem:[%s1449_s30 + $0x50] sm:$0xff]  ;;  %p1260_p0 = pneg %p1259_p13 }
  0x22   : > { %1051 = vmatmul.mubr.msk.bf16.vlgmr.msra.gmra.mxu0 %vm382_vm1, %v369_v24  ;;  %v494_v51 = vpack.c.bf16 %v477_v48, %v476_v47  ;;  %v459_v53 = vld [vmem:[%s1449_s30 + $0x58] sm:$0xff]  ;;  %v478_v54 = vld [vmem:[%s1449_s30 + $0xf0] sm:$0xff] }
  0x23   : > { %1162 = vmatpush3.bf16.msra.mxu0 %v553_v1  ;;  %1163 = vmatprep.mubr.msk.bf16.mxu0 %vm382_vm1, %v480_v25  ;;  %v479_v55 = vld [vmem:[%s1449_s30 + $0xf8] sm:$0xff]  ;;  %v485_v56 = vpack.c.bf16 %v459_v53, %v458_v52  ;;  %s1520_s30 = scalar_lea.vmem %s1681_s7, %s1110_s20  ;;  %s1336_s20 = smov [#allocation2]  }
  0x24   : > { %1180 = vmatmul.mubr.msk.bf16.gmra.mxu1 %vm382_vm1, %v489_v26  ;;  %v495_v57 = vpack.c.bf16 %v479_v55, %v478_v54  ;;  %s1261_s22 = sshll.u32 %s1336_s20, 4  ;;  %s1262_s22 = int_to_ptr.vmem [resolvable:$false] %s1261_s22 }
  0x25   : > { %1183 = vmatprep.mubr.msk.bf16.mxu1 %vm382_vm1, %v490_v27  ;;  %s1263_s23 = scalar_lea.vmem %s1262_s22, 128  ;;  %p1264_p1 = scmp.lt.s32.totalorder %s1546_s12, %s1262_s22 }
  0x26   : > { %p1265_p2 = scmp.lt.s32.totalorder %s1263_s23, %s1257_s18 }
  0x28   : > { %p1266_p3 = por %p1265_p2, %p1264_p1 }
  0x2a   : > { %1164 = vmatmul.mubr.msk.bf16.vlgmr.msra.gmra.mxu0 %vm382_vm1, %v481_v34  ;;  %p1267_p5 = pnand %p1266_p3, %p1260_p0 }
  0x2b   : > { %1167 = vmatprep.mubr.msk.bf16.mxu0 %vm382_vm1, %v482_v37 }
  0x2c   : > { %1184 = vmatmul.mubr.msk.bf16.gmra.mxu1 %vm382_vm1, %v491_v38 }
  0x2d   : > { %1187 = vmatprep.mubr.msk.bf16.mxu1 %vm382_vm1, %v492_v39 }
  0x32   : > { %1168 = vmatmul.mubr.msk.bf16.gmra.mxu0 %vm382_vm1, %v483_v46 }
  0x33   : > { %1171 = vmatprep.mubr.msk.bf16.mxu0 %vm382_vm1, %v484_v49 }
  0x34   : > { %1188 = vmatmul.mubr.msk.bf16.gmra.mxu1 %vm382_vm1, %v493_v50 }
  0x35   : > { %1191 = vmatprep.mubr.msk.bf16.mxu1 %vm382_vm1, %v494_v51 }
  0x3a   : > { %1172 = vmatmul.mubr.msk.bf16.gmra.mxu0 %vm382_vm1, %v485_v56 }
  0x3c   : > { %1192 = vmatmul.mubr.msk.bf16.gmra.mxu1 %vm382_vm1, %v495_v57 }
  0x92   : > { %v380_v1 = vpop.permute.xlu0 %379 }
  0xdc   : > { %v1177_v59 = vpop.f32.mrf.mxu1 }
  0xdd   : > { %v646_v60 = vadd.f32 %v1177_v59, %v1512_v58 }
  0xde   : > { %v637_v61 = vpop.f32.mrf.mxu1 }
  0xdf   : > { %v1125_v62 = vpack.c.bf16 %v646_v60, %v646_v60  ;;  %v638_v63 = vadd.f32 %v1512_v58, %v637_v61 }
  0xe0   : > { %v1178_v0 = vpop.f32.mrf.mxu1 }
  0xe1   : > { %859 = vst.msk [vmem:[%s1520_s30 + $0x38] sm:$0xf] %vm844_vm2, %v1125_v62  ;;  %v1123_v2 = vpack.c.bf16 %v638_v63, %v638_v63  ;;  %v649_v3 = vadd.f32 %v1178_v0, %v1512_v58 }
  0xe2   : > { %v427_v4 = vpop.f32.mrf.mxu0  ;;  %v640_v5 = vpop.f32.mrf.mxu1 }
  0xe3   : > { %857 = vst.msk [vmem:[%s1520_s30 + $0x30] sm:$0xf] %vm844_vm2, %v1123_v2  ;;  %v1126_v6 = vpack.c.bf16 %v649_v3, %v649_v3  ;;  %v641_v7 = vadd.f32 %v1512_v58, %v640_v5  ;;  %v428_v8 = vadd.f32 %v427_v4, %v380_v1 }
  0xe4   : > { %v429_v9 = vpop.f32.mrf.mxu0  ;;  %v1181_v10 = vpop.f32.mrf.mxu1 }
  0xe5   : > { %860 = vst.msk [vmem:[%s1520_s30 + $0x3c] sm:$0xf] %vm844_vm2, %v1126_v6  ;;  %v1124_v11 = vpack.c.bf16 %v641_v7, %v641_v7  ;;  %v430_v12 = vadd.f32 %v429_v9, %v380_v1  ;;  %v662_v13 = vadd.f32 %v1181_v10, %v1512_v58 }
  0xe6   : > { %v431_v14 = vpop.f32.mrf.mxu0  ;;  %v653_v15 = vpop.f32.mrf.mxu1 }
  0xe7   : > { %858 = vst.msk [vmem:[%s1520_s30 + $0x34] sm:$0xf] %vm844_vm2, %v1124_v11  ;;  %v1052_v16 = vpack.c.bf16 %v430_v12, %v428_v8  ;;  %v1129_v17 = vpack.c.bf16 %v662_v13, %v662_v13  ;;  %v654_v18 = vadd.f32 %v1512_v58, %v653_v15 }
  0xe8   : > { %v432_v19 = vpop.f32.mrf.mxu0  ;;  %v1182_v20 = vpop.f32.mrf.mxu1 }
  0xe9   : > { %863 = vst.msk [vmem:[%s1520_s30 + $0x48] sm:$0xf] %vm844_vm2, %v1129_v17  ;;  %v1127_v21 = vpack.c.bf16 %v654_v18, %v654_v18  ;;  %v665_v22 = vadd.f32 %v1182_v20, %v1512_v58  ;;  %1053 = vst.sshfl [vmem:[%s325_s10] sm:$0x33 pattern:$0x76325410] %v1052_v16 }
  0xea   : > { %v1165_v23 = vpop.f32.mrf.mxu0  ;;  %v656_v24 = vpop.f32.mrf.mxu1 }
  0xeb   : > { %1270 = shalt.err (!%p1267_p5)
}
  0xec   : > { %s1271_s19 = scalar_lea.hbm %s1544_s16, 64  ;;  %s1275_s10 = scalar_lea.hbm %s1680_s6, 128 }
  0xed   : > { %p1272_p6 = scmp.ne.s32.totalorder %s1544_s16, %s1271_s19  ;;  %p1276_p10 = scmp.lt.s32.totalorder %s1544_s16, %s1680_s6 }
  0xee   : > { %p1277_p11 = scmp.lt.s32.totalorder %s1275_s10, %s1271_s19 }
  0xef   : > { %p1273_p7 = pnand %p1272_p6, %p1417_p4 }
  0xf0   : > { %p1278_p12 = por %p1277_p11, %p1276_p10 }
  0xf1   : > { %p1274_p9 = pneg %p1273_p7 }
  0xf3   : > { %p1279_p13 = pnand %p1278_p12, %p1274_p9 }
  0xf5   : > { %1282 = shalt.err (!%p1279_p13)
}
  0xf6   : > { %1199 = dma.vmem_to_hbm [thread:$0]  (%p1417_p4), %s1546_s12, 64, %s1544_s16, %s878_s17   ;;  %861 = vst.msk [vmem:[%s1520_s30 + $0x40] sm:$0xf] %vm844_vm2, %v1127_v21  ;;  %v1130_v25 = vpack.c.bf16 %v665_v22, %v665_v22  ;;  %v598_v26 = vadd.f32 %v1165_v23, %v1512_v58  ;;  %v657_v27 = vadd.f32 %v1512_v58, %v656_v24  ;;  %v589_v28 = vpop.f32.mrf.mxu0  ;;  %v1185_v29 = vpop.f32.mrf.mxu1 }
  0xf7   : > { %v590_v32 = vadd.f32 %v1512_v58, %v589_v28  ;;  %v678_v33 = vadd.f32 %v1185_v29, %v1512_v58 }
  0xf8   : > { %864 = vst.msk [vmem:[%s1520_s30 + $0x4c] sm:$0xf] %vm844_vm2, %v1130_v25  ;;  %v1113_v30 = vpack.c.bf16 %v598_v26, %v598_v26  ;;  %v1128_v31 = vpack.c.bf16 %v657_v27, %v657_v27  ;;  %v1166_v34 = vpop.f32.mrf.mxu0  ;;  %v669_v35 = vpop.f32.mrf.mxu1 }
  0xf9   : > { %v1111_v36 = vpack.c.bf16 %v590_v32, %v590_v32  ;;  %v1133_v37 = vpack.c.bf16 %v678_v33, %v678_v33  ;;  %v601_v38 = vadd.f32 %v1166_v34, %v1512_v58  ;;  %v670_v39 = vadd.f32 %v1512_v58, %v669_v35 }
  0xfa   : > { %847 = vst.msk [vmem:[%s1520_s30 + $0x8] sm:$0xf] %vm844_vm2, %v1113_v30  ;;  %862 = vst.msk [vmem:[%s1520_s30 + $0x44] sm:$0xf] %vm844_vm2, %v1128_v31  ;;  %v592_v40 = vpop.f32.mrf.mxu0  ;;  %v1186_v41 = vpop.f32.mrf.mxu1 }
  0xfb   : > { %845 = vst.msk [vmem:[%s1520_s30] sm:$0xf] %vm844_vm2, %v1111_v36  ;;  %867 = vst.msk [vmem:[%s1520_s30 + $0x58] sm:$0xf] %vm844_vm2, %v1133_v37  ;;  %v1114_v42 = vpack.c.bf16 %v601_v38, %v601_v38  ;;  %v1131_v43 = vpack.c.bf16 %v670_v39, %v670_v39  ;;  %v593_v44 = vadd.f32 %v1512_v58, %v592_v40 }
  0xfc   : > { %v681_v45 = vadd.f32 %v1186_v41, %v1512_v58  ;;  %v1169_v46 = vpop.f32.mrf.mxu0  ;;  %v672_v47 = vpop.f32.mrf.mxu1 }
  0xfd   : > { %848 = vst.msk [vmem:[%s1520_s30 + $0xc] sm:$0xf] %vm844_vm2, %v1114_v42  ;;  %865 = vst.msk [vmem:[%s1520_s30 + $0x50] sm:$0xf] %vm844_vm2, %v1131_v43  ;;  %v1112_v48 = vpack.c.bf16 %v593_v44, %v593_v44  ;;  %v614_v50 = vadd.f32 %v1169_v46, %v1512_v58  ;;  %v673_v51 = vadd.f32 %v1512_v58, %v672_v47 }
  0xfe   : > { %v1134_v49 = vpack.c.bf16 %v681_v45, %v681_v45  ;;  %v605_v52 = vpop.f32.mrf.mxu0  ;;  %v1189_v53 = vpop.f32.mrf.mxu1 }
  0xff   : > { %846 = vst.msk [vmem:[%s1520_s30 + $0x4] sm:$0xf] %vm844_vm2, %v1112_v48  ;;  %v1117_v54 = vpack.c.bf16 %v614_v50, %v614_v50  ;;  %v1132_v55 = vpack.c.bf16 %v673_v51, %v673_v51  ;;  %v606_v56 = vadd.f32 %v1512_v58, %v605_v52  ;;  %v694_v57 = vadd.f32 %v1189_v53, %v1512_v58 }
 0x100   : > { %868 = vst.msk [vmem:[%s1520_s30 + $0x5c] sm:$0xf] %vm844_vm2, %v1134_v49  ;;  %v1170_v59 = vpop.f32.mrf.mxu0  ;;  %v685_v60 = vpop.f32.mrf.mxu1 }
 0x101   : > { %851 = vst.msk [vmem:[%s1520_s30 + $0x18] sm:$0xf] %vm844_vm2, %v1117_v54  ;;  %866 = vst.msk [vmem:[%s1520_s30 + $0x54] sm:$0xf] %vm844_vm2, %v1132_v55  ;;  %v1115_v61 = vpack.c.bf16 %v606_v56, %v606_v56  ;;  %v1137_v62 = vpack.c.bf16 %v694_v57, %v694_v57  ;;  %v617_v63 = vadd.f32 %v1170_v59, %v1512_v58 }
 0x102   : > { %v686_v0 = vadd.f32 %v1512_v58, %v685_v60  ;;  %v608_v1 = vpop.f32.mrf.mxu0  ;;  %v1190_v2 = vpop.f32.mrf.mxu1 }
 0x103   : > { %849 = vst.msk [vmem:[%s1520_s30 + $0x10] sm:$0xf] %vm844_vm2, %v1115_v61  ;;  %871 = vst.msk [vmem:[%s1520_s30 + $0x68] sm:$0xf] %vm844_vm2, %v1137_v62  ;;  %v1118_v3 = vpack.c.bf16 %v617_v63, %v617_v63  ;;  %v609_v5 = vadd.f32 %v1512_v58, %v608_v1  ;;  %v697_v6 = vadd.f32 %v1190_v2, %v1512_v58 }
 0x104   : > { %v1135_v4 = vpack.c.bf16 %v686_v0, %v686_v0  ;;  %v1173_v7 = vpop.f32.mrf.mxu0  ;;  %v688_v8 = vpop.f32.mrf.mxu1 }
 0x105   : > { %852 = vst.msk [vmem:[%s1520_s30 + $0x1c] sm:$0xf] %vm844_vm2, %v1118_v3  ;;  %v1116_v9 = vpack.c.bf16 %v609_v5, %v609_v5  ;;  %v1138_v10 = vpack.c.bf16 %v697_v6, %v697_v6  ;;  %v630_v11 = vadd.f32 %v1173_v7, %v1512_v58  ;;  %v689_v12 = vadd.f32 %v1512_v58, %v688_v8 }
 0x106   : > { %869 = vst.msk [vmem:[%s1520_s30 + $0x60] sm:$0xf] %vm844_vm2, %v1135_v4  ;;  %v621_v13 = vpop.f32.mrf.mxu0  ;;  %v1193_v14 = vpop.f32.mrf.mxu1 }
 0x107   : > { %850 = vst.msk [vmem:[%s1520_s30 + $0x14] sm:$0xf] %vm844_vm2, %v1116_v9  ;;  %872 = vst.msk [vmem:[%s1520_s30 + $0x6c] sm:$0xf] %vm844_vm2, %v1138_v10  ;;  %v1121_v15 = vpack.c.bf16 %v630_v11, %v630_v11  ;;  %v1136_v16 = vpack.c.bf16 %v689_v12, %v689_v12  ;;  %v622_v17 = vadd.f32 %v1512_v58, %v621_v13 }
 0x108   : > { %v710_v18 = vadd.f32 %v1193_v14, %v1512_v58  ;;  %v1174_v19 = vpop.f32.mrf.mxu0  ;;  %v701_v20 = vpop.f32.mrf.mxu1 }
 0x109   : > { %855 = vst.msk [vmem:[%s1520_s30 + $0x28] sm:$0xf] %vm844_vm2, %v1121_v15  ;;  %870 = vst.msk [vmem:[%s1520_s30 + $0x64] sm:$0xf] %vm844_vm2, %v1136_v16  ;;  %v1119_v21 = vpack.c.bf16 %v622_v17, %v622_v17  ;;  %v633_v23 = vadd.f32 %v1174_v19, %v1512_v58  ;;  %v702_v24 = vadd.f32 %v1512_v58, %v701_v20 }
 0x10a   : > { %v1141_v22 = vpack.c.bf16 %v710_v18, %v710_v18  ;;  %v624_v25 = vpop.f32.mrf.mxu0  ;;  %v1194_v26 = vpop.f32.mrf.mxu1 }
 0x10b   : > { %853 = vst.msk [vmem:[%s1520_s30 + $0x20] sm:$0xf] %vm844_vm2, %v1119_v21  ;;  %v1122_v27 = vpack.c.bf16 %v633_v23, %v633_v23  ;;  %v1139_v28 = vpack.c.bf16 %v702_v24, %v702_v24  ;;  %v625_v29 = vadd.f32 %v1512_v58, %v624_v25  ;;  %v713_v30 = vadd.f32 %v1194_v26, %v1512_v58 }
 0x10c   : > { %875 = vst.msk [vmem:[%s1520_s30 + $0x78] sm:$0xf] %vm844_vm2, %v1141_v22  ;;  %v704_v31 = vpop.f32.mrf.mxu1 }
 0x10d   : > { %856 = vst.msk [vmem:[%s1520_s30 + $0x2c] sm:$0xf] %vm844_vm2, %v1122_v27  ;;  %873 = vst.msk [vmem:[%s1520_s30 + $0x70] sm:$0xf] %vm844_vm2, %v1139_v28  ;;  %v1120_v32 = vpack.c.bf16 %v625_v29, %v625_v29  ;;  %v1142_v33 = vpack.c.bf16 %v713_v30, %v713_v30  ;;  %v705_v34 = vadd.f32 %v1512_v58, %v704_v31 }
 0x10f   : > { %854 = vst.msk [vmem:[%s1520_s30 + $0x24] sm:$0xf] %vm844_vm2, %v1120_v32  ;;  %876 = vst.msk [vmem:[%s1520_s30 + $0x7c] sm:$0xf] %vm844_vm2, %v1142_v33  ;;  %v1140_v35 = vpack.c.bf16 %v705_v34, %v705_v34 }
 0x111   : > { %874 = vst.msk [vmem:[%s1520_s30 + $0x74] sm:$0xf] %vm844_vm2, %v1140_v35 }
 0x112 PF: > { %p1205_p4 = scmp.ge.s32.totalorder %s1333_s29, 2  ;;  %s919_s11 = sand.u32 1, %s1313_s24  }
 0x113   : > { %s920_s12 = scalar_lea.sflag [#allocation3], %s919_s11 }
 0x114   : > { %p1202_p0 = pnand %p1205_p4, %p1424_p8 }
 0x116   : > { %p1203_p1 = pneg %p1202_p0 }
 0x118   : > { %1308 = dma.done.wait (%p1203_p1), %s920_s12, 64  }
 0x119   : > { %1310 = vsyncadd (%p1203_p1), %s920_s12, 4294967232  ;;  %s21_s29 = sadd.s32 1, %s1333_s29   ;;  %s1684_s24 = smov %s1317_s25 }
 0x11a   : > { %p18_p2 = scmp.ge.s32.totalorder %s21_s29, 4   ;;  %s1685_s25 = smov %s1321_s26 }
 0x11b   : > { %s1686_s26 = smov %s1430_s14  ;;  %s1687_s27 = smov %s1329_s28 }
 0x11c   : > { %s1688_s28 = smov %s1690_s9  ;;  %20 = sbr.rel (!%p18_p2) target bundleno = 4 (0x4), region = 94 }
 0x121   :  { %937 = vsyncpa [#allocation3], 1 }
 0x122   :  { %939 = vsyncpa [#allocation3 + $0x1], 1 }

</bundles_post_ra>
